<compile_context>
chip_gen: v7x
topology: tpu7x:2x2x1
jax: 0.10.0
libtpu: 0.0.40
codegen_flags: <defaults>
</compile_context>

<pallas_src>
import math
import functools

import jax
import jax.numpy as jnp
from jax.experimental import pallas as pl
from jax.experimental.pallas import tpu as pltpu


# ----------------------------------------------------------------------------
# Fused kernel: one grid step == one LSTMCellLayer
# ----------------------------------------------------------------------------
def _fused_lstm_kernel(x_ref, wx0_ref, h_ref, c_ref, w_ref, b_ref,
                       h_out_ref, c_out_ref, lhs_ref, xg_ref, *, ph):
    """One stacked-LSTM layer per grid step.

    x_ref    : (B, P_in)        bf16  padded external input (resident)
    wx0_ref  : (P_in, 4*P_h)    bf16  layer-0 input weight (resident)
    h_ref    : (1, B, P_h)      bf16  this layer's previous hidden state
    c_ref    : (1, B, P_h)      f32   this layer's previous cell state
    w_ref    : (1, 2P_h, 4P_h)  bf16  [Wx_l ; Wh_l] (Wx rows zero for layer 0)
    b_ref    : (1, 1, 4P_h)     f32   gate bias (per-gate columns padded)
    h_out_ref: (1, B, P_h)      bf16
    c_out_ref: (1, B, P_h)      f32
    lhs_ref  : (B, 2P_h)        bf16  staged [layer_input ; h_prev] (VMEM)
    xg_ref   : (B, 4P_h)        f32   layer-0 x-projection pre-accumulator
    """
    layer = pl.program_id(0)
    bsz = lhs_ref.shape[0]

    # Upper half of the staged LHS is always this layer's previous hidden.
    lhs_ref[:, ph:] = h_ref[0]

    @pl.when(layer == 0)
    def _():
        # Layer 0: lower LHS half is zero (its Wx rows in the slab are zero
        # too); x's contribution comes from the resident Wx0 matmul.
        lhs_ref[:, :ph] = jnp.zeros((bsz, ph), lhs_ref.dtype)
        xg_ref[...] = jnp.dot(x_ref[...], wx0_ref[...],
                              preferred_element_type=jnp.float32)

    @pl.when(layer != 0)
    def _():
        xg_ref[...] = jnp.zeros_like(xg_ref)

    # Single K = 2*P_h matmul: [input ; h_prev] @ [Wx ; Wh], f32 accumulation.
    gates = (xg_ref[...]
             + jnp.dot(lhs_ref[...], w_ref[0],
                       preferred_element_type=jnp.float32)
             + b_ref[0])                                  # (B, 4P_h) f32

    # P_h is a multiple of 128, so these slices are vreg-lane aligned (free).
    i = jax.nn.sigmoid(gates[:, 0 * ph:1 * ph])
    f = jax.nn.sigmoid(gates[:, 1 * ph:2 * ph])
    o = jax.nn.sigmoid(gates[:, 2 * ph:3 * ph])
    g = jnp.tanh(gates[:, 3 * ph:4 * ph])

    c_new = c_ref[0] * f + g * i
    h_new = jnp.tanh(c_new) * o

    h_out_ref[0] = h_new.astype(h_out_ref.dtype)     # bf16 writeback
    c_out_ref[0] = c_new                             # f32
    # Feed the next layer (stays in VMEM, never hits HBM between layers).
    lhs_ref[:, :ph] = h_new.astype(lhs_ref.dtype)


# ----------------------------------------------------------------------------
# One-time parameter packing (wrapper-side, plain JAX — call ONCE per model)
# ----------------------------------------------------------------------------
def _round_up(x, m):
    return (x + m - 1) // m * m


def _pad_gate_cols(w, hidden, ph):
    """(rows, 4*hidden) -> (rows, 4*ph): each gate's columns zero-padded."""
    rows = w.shape[0]
    w4 = w.reshape(rows, 4, hidden)
    w4 = jnp.pad(w4, ((0, 0), (0, 0), (0, ph - hidden)))
    return w4.reshape(rows, 4 * ph)


def pack_lstm_params(params, embed_dim, hidden):
    """Pack per-layer (wx, wh, b) into padded device slabs. Call once."""
    depth = len(params)
    ph = _round_up(max(hidden, 1), 128)
    pin = _round_up(max(embed_dim, 1), 128)

    wx0, _, _ = params[0]
    wx0_p = jnp.pad(_pad_gate_cols(wx0, hidden, ph),
                    ((0, pin - embed_dim), (0, 0))).astype(jnp.bfloat16)

    w_blocks, b_blocks = [], []
    for l, (wx, wh, b) in enumerate(params):
        wh_p = jnp.pad(_pad_gate_cols(wh, hidden, ph),
                       ((0, ph - hidden), (0, 0)))
        if l == 0:
            # Layer 0's x-weight lives in wx0_p; its slab slot stays zero.
            wx_p = jnp.zeros((ph, 4 * ph), jnp.float32)
        else:
            in_dim = wx.shape[0]                     # == hidden for l > 0
            wx_p = jnp.pad(_pad_gate_cols(wx, hidden, ph),
                           ((0, ph - in_dim), (0, 0)))
        w_blocks.append(jnp.concatenate([wx_p, wh_p], axis=0))  # (2P_h, 4P_h)
        b_blocks.append(_pad_gate_cols(b.reshape(1, 4 * hidden), hidden, ph))

    return {
        "wx0": wx0_p,                                    # (P_in, 4P_h) bf16
        "w": jnp.stack(w_blocks).astype(jnp.bfloat16),   # (D, 2P_h, 4P_h) bf16
        "b": jnp.stack(b_blocks),                        # (D, 1, 4P_h) f32
        "depth": depth, "hidden": hidden, "embed_dim": embed_dim,
        "ph": ph, "pin": pin,
    }


def init_layer_params(key, in_dim, hidden):
    """Deterministic init mimicking nn.Linear(in_dim + hidden, 4*hidden)."""
    fan_in = in_dim + hidden
    bound = 1.0 / math.sqrt(fan_in)
    k_w, k_b = jax.random.split(key)
    weight = jax.random.uniform(k_w, (4 * hidden, fan_in),
                                minval=-bound, maxval=bound, dtype=jnp.float32)
    bias = jax.random.uniform(k_b, (4 * hidden,),
                              minval=-bound, maxval=bound, dtype=jnp.float32)
    w_t = weight.T                       # (in_dim + hidden, 4h)
    wx = w_t[:in_dim, :]                 # (in_dim, 4h)
    wh = w_t[in_dim:, :]                 # (hidden, 4h)
    return wx, wh, bias


# ----------------------------------------------------------------------------
# Per-timestep forward (matches LSTMCell.forward, trainable=False)
# ----------------------------------------------------------------------------
def lstm_cell_forward(x, state, packed):
    """x: (B, embedDim) f32.  state: None, or the (h, c) padded stacks returned
    by a previous call (h: (D,B,P_h) bf16, c: (D,B,P_h) f32; padded lanes 0).
    Returns (out (B, hidden) f32, (h_new, c_new) padded stacks)."""
    B = x.shape[0]
    depth, hidden = packed["depth"], packed["hidden"]
    embed_dim = packed["embed_dim"]
    ph, pin = packed["ph"], packed["pin"]

    x_p = jnp.pad(x, ((0, 0), (0, pin - embed_dim))).astype(jnp.bfloat16)

    if state is None:
        h_stack = jnp.zeros((depth, B, ph), jnp.bfloat16)
        c_stack = jnp.zeros((depth, B, ph), jnp.float32)
    else:
        h_stack, c_stack = state

    # VMEM budget: keep the whole-layer weight block double-buffered; stay
    # safely below v7x's 64 MiB physical VMEM.  (Tile 4*P_h beyond that.)
    w_block = 2 * ph * 4 * ph * 2                      # bf16 weight block
    resident = pin * 4 * ph * 2 + B * pin * 2          # wx0 + x
    per_step = 2 * (B * ph * 2 + B * ph * 4) + 4 * ph * 4
    scratch = B * 2 * ph * 2 + B * 4 * ph * 4
    needed = 2 * (w_block + per_step) + resident + scratch
    vmem_limit = int(min(max(2 * needed, 8 * 2 ** 20), 48 * 2 ** 20))

    kernel = functools.partial(_fused_lstm_kernel, ph=ph)
    h_new, c_new = pl.pallas_call(
        kernel,
        out_shape=(jax.ShapeDtypeStruct((depth, B, ph), jnp.bfloat16),
                   jax.ShapeDtypeStruct((depth, B, ph), jnp.float32)),
        grid=(depth,),
        in_specs=[
            pl.BlockSpec((B, pin), lambda l: (0, 0)),                # x (resident)
            pl.BlockSpec((pin, 4 * ph), lambda l: (0, 0)),           # Wx0 (resident)
            pl.BlockSpec((1, B, ph), lambda l: (l, 0, 0)),           # h_prev[l]
            pl.BlockSpec((1, B, ph), lambda l: (l, 0, 0)),           # c_prev[l]
            pl.BlockSpec((1, 2 * ph, 4 * ph), lambda l: (l, 0, 0)),  # W[l]
            pl.BlockSpec((1, 1, 4 * ph), lambda l: (l, 0, 0)),       # b[l]
        ],
        out_specs=(pl.BlockSpec((1, B, ph), lambda l: (l, 0, 0)),
                   pl.BlockSpec((1, B, ph), lambda l: (l, 0, 0))),
        scratch_shapes=[pltpu.VMEM((B, 2 * ph), jnp.bfloat16),   # staged [x;h]
                        pltpu.VMEM((B, 4 * ph), jnp.float32)],   # layer-0 x-proj
        compiler_params=pltpu.CompilerParams(
            dimension_semantics=("arbitrary",),
            vmem_limit_bytes=vmem_limit),
    )(x_p, packed["wx0"], h_stack, c_stack, packed["w"], packed["b"])

    out = h_new[depth - 1, :, :hidden].astype(jnp.float32)
    return out, (h_new, c_new)


# ----------------------------------------------------------------------------
# Pure-JAX f32 reference
# ----------------------------------------------------------------------------
def reference_forward(x, state, params):
    B = x.shape[0]
    hidden = params[0][1].shape[0]
    if state is None:
        state = [(jnp.zeros((B, hidden), jnp.float32),
                  jnp.zeros((B, hidden), jnp.float32)) for _ in params]
    out = x
    new_state = []
    hi = jax.lax.Precision.HIGHEST
    for (wx, wh, b), (h_prev, c_prev) in zip(params, state):
        gates = (jnp.dot(out, wx, precision=hi)
                 + jnp.dot(h_prev, wh, precision=hi) + b)
        i, f, o, g = jnp.split(gates, 4, axis=1)
        i, f, o = jax.nn.sigmoid(i), jax.nn.sigmoid(f), jax.nn.sigmoid(o)
        g = jnp.tanh(g)
        c_new = c_prev * f + g * i
        h_new = jnp.tanh(c_new) * o
        new_state.append((h_new, c_new))
        out = h_new
    return out, new_state


if __name__ == "__main__":
    batch = 8
    embed_dim = 16
    hidden = 32
    depth = 2

    root = jax.random.PRNGKey(0)
    k_x, k_x2, k_p = jax.random.split(root, 3)
    x = jax.random.normal(k_x, (batch, embed_dim), dtype=jnp.float32)
    x2 = jax.random.normal(k_x2, (batch, embed_dim), dtype=jnp.float32)

    layer_keys = jax.random.split(k_p, depth)
    params = []
    for l in range(depth):
        in_dim = embed_dim if l == 0 else hidden
        params.append(init_layer_params(layer_keys[l], in_dim, hidden))

    packed = pack_lstm_params(params, embed_dim, hidden)   # one-time packing

    # Step 1: s=None -> zero-initialized state (initializeIfNone), trainable=False.
    out, (h_st, c_st) = lstm_cell_forward(x, None, packed)
    out = jax.block_until_ready(out)
    jax.block_until_ready(h_st)
    jax.block_until_ready(c_st)

    ref_out, ref_state = reference_forward(x, None, params)
    assert jnp.allclose(out, ref_out, atol=2e-2, rtol=2e-2)
    for l, (h_r, c_r) in enumerate(ref_state):
        assert jnp.allclose(h_st[l, :, :hidden].astype(jnp.float32), h_r,
                            atol=2e-2, rtol=2e-2)
        assert jnp.allclose(c_st[l, :, :hidden], c_r, atol=2e-2, rtol=2e-2)
    # Kernel invariant: padded lanes of the recurrent state stay exactly zero.
    assert jnp.all(h_st[:, :, hidden:] == 0)
    assert jnp.all(c_st[:, :, hidden:] == 0)

    # Step 2: feed the padded state straight back in (fast recurrent path).
    out2, _ = lstm_cell_forward(x2, (h_st, c_st), packed)
    out2 = jax.block_until_ready(out2)
    state_f32 = [(h_st[l, :, :hidden].astype(jnp.float32), c_st[l, :, :hidden])
                 for l in range(depth)]
    ref_out2, _ = reference_forward(x2, state_f32, params)
    assert jnp.allclose(out2, ref_out2, atol=2e-2, rtol=2e-2)

    print("KERNEL_OK")
</pallas_src>

<mosaic_0001>
module attributes {stable_mosaic.version = 11 : i64} {
  func.func @_fused_lstm_kernel(%arg0: i32, %arg1: memref<8x128xbf16, #tpu.memory_space<vmem>>, %arg2: memref<128x512xbf16, #tpu.memory_space<vmem>>, %arg3: memref<1x8x128xbf16, #tpu.memory_space<vmem>>, %arg4: memref<1x8x128xf32, #tpu.memory_space<vmem>>, %arg5: memref<1x256x512xbf16, #tpu.memory_space<vmem>>, %arg6: memref<1x1x512xf32, #tpu.memory_space<vmem>>, %arg7: memref<1x8x128xbf16, #tpu.memory_space<vmem>>, %arg8: memref<1x8x128xf32, #tpu.memory_space<vmem>>, %arg9: memref<8x256xbf16, #tpu.memory_space<vmem>>, %arg10: memref<8x512xf32, #tpu.memory_space<vmem>>) attributes {dimension_semantics = [#tpu.dimension_semantics<arbitrary>], iteration_bounds = array<i64: 2>, scalar_prefetch = 0 : i64, scratch_operands = 2 : i64, tpu.core_type = #tpu.core_type<tc>, window_params = [{pipeline_mode = #tpu.pipeline_mode<synchronous>, transform_indices = @transform_0, window_bounds = array<i64: 8, 128>}, {pipeline_mode = #tpu.pipeline_mode<synchronous>, transform_indices = @transform_1, window_bounds = array<i64: 128, 512>}, {transform_indices = @transform_2, window_bounds = array<i64: 1, 8, 128>}, {transform_indices = @transform_3, window_bounds = array<i64: 1, 8, 128>}, {transform_indices = @transform_4, window_bounds = array<i64: 1, 256, 512>}, {transform_indices = @transform_5, window_bounds = array<i64: 1, 1, 512>}, {transform_indices = @transform_6, window_bounds = array<i64: 1, 8, 128>}, {transform_indices = @transform_7, window_bounds = array<i64: 1, 8, 128>}]} {
    %c0 = arith.constant 0 : index
    %c0_0 = arith.constant 0 : index
    %c0_1 = arith.constant 0 : index
    %0 = vector.load %arg3[%c0, %c0_0, %c0_1] : memref<1x8x128xbf16, #tpu.memory_space<vmem>>, vector<1x8x128xbf16>
    %1 = vector.shape_cast %0 : vector<1x8x128xbf16> to vector<8x128xbf16>
    %c0_2 = arith.constant 0 : index
    %c128 = arith.constant 128 : index
    %2 = vector.load %arg9[%c0_2, %c128] : memref<8x256xbf16, #tpu.memory_space<vmem>>, vector<8x128xbf16>
    tpu.vector_store %arg9[%c0_2, %c128], %1 {strides = array<i32>} : memref<8x256xbf16, #tpu.memory_space<vmem>>, vector<8x128xbf16>,
    %c0_i32 = arith.constant 0 : i32
    %3 = arith.cmpi eq, %arg0, %c0_i32 : i32
    %4 = arith.extui %3 : i1 to i32
    %c0_i32_3 = arith.constant 0 : i32
    %5 = arith.cmpi ne, %4, %c0_i32_3 : i32
    scf.if %5 {
      %cst_30 = arith.constant 0.000000e+00 : bf16
      %55 = vector.broadcast %cst_30 : bf16 to vector<8x128xbf16>
      %c0_31 = arith.constant 0 : index
      %c0_32 = arith.constant 0 : index
      %56 = vector.load %arg9[%c0_31, %c0_32] : memref<8x256xbf16, #tpu.memory_space<vmem>>, vector<8x128xbf16>
      tpu.vector_store %arg9[%c0_31, %c0_32], %55 {strides = array<i32>} : memref<8x256xbf16, #tpu.memory_space<vmem>>, vector<8x128xbf16>,
      %c0_33 = arith.constant 0 : index
      %c0_34 = arith.constant 0 : index
      %57 = vector.load %arg1[%c0_33, %c0_34] : memref<8x128xbf16, #tpu.memory_space<vmem>>, vector<8x128xbf16>
      %c0_35 = arith.constant 0 : index
      %c0_36 = arith.constant 0 : index
      %58 = vector.load %arg2[%c0_35, %c0_36] : memref<128x512xbf16, #tpu.memory_space<vmem>>, vector<128x512xbf16>
      %cst_37 = arith.constant dense<0.000000e+00> : vector<8x512xf32>
      %59 = tpu.matmul %57, %58, %cst_37 {dimension_numbers = #tpu.dot_dimension_numbers<[1], [0], [0], [1], [0, 0, 1, 1], [], []>} : vector<8x128xbf16>, vector<128x512xbf16>, vector<8x512xf32> -> vector<8x512xf32>
      %c0_38 = arith.constant 0 : index
      %c0_39 = arith.constant 0 : index
      %60 = vector.load %arg10[%c0_38, %c0_39] : memref<8x512xf32, #tpu.memory_space<vmem>>, vector<8x512xf32>
      tpu.vector_store %arg10[%c0_38, %c0_39], %59 {strides = array<i32>} : memref<8x512xf32, #tpu.memory_space<vmem>>, vector<8x512xf32>,
    } else {
    }
    %c0_i32_4 = arith.constant 0 : i32
    %6 = arith.cmpi ne, %arg0, %c0_i32_4 : i32
    %7 = arith.extui %6 : i1 to i32
    %c0_i32_5 = arith.constant 0 : i32
    %8 = arith.cmpi ne, %7, %c0_i32_5 : i32
    scf.if %8 {
      %cst_30 = arith.constant 0.000000e+00 : f32
      %55 = vector.broadcast %cst_30 : f32 to vector<8x512xf32>
      %c0_31 = arith.constant 0 : index
      %c0_32 = arith.constant 0 : index
      %56 = vector.load %arg10[%c0_31, %c0_32] : memref<8x512xf32, #tpu.memory_space<vmem>>, vector<8x512xf32>
      tpu.vector_store %arg10[%c0_31, %c0_32], %55 {strides = array<i32>} : memref<8x512xf32, #tpu.memory_space<vmem>>, vector<8x512xf32>,
    } else {
    }
    %c0_6 = arith.constant 0 : index
    %c0_7 = arith.constant 0 : index
    %9 = vector.load %arg10[%c0_6, %c0_7] : memref<8x512xf32, #tpu.memory_space<vmem>>, vector<8x512xf32>
    %c0_8 = arith.constant 0 : index
    %c0_9 = arith.constant 0 : index
    %10 = vector.load %arg9[%c0_8, %c0_9] : memref<8x256xbf16, #tpu.memory_space<vmem>>, vector<8x256xbf16>
    %c0_10 = arith.constant 0 : index
    %c0_11 = arith.constant 0 : index
    %c0_12 = arith.constant 0 : index
    %11 = vector.load %arg5[%c0_10, %c0_11, %c0_12] : memref<1x256x512xbf16, #tpu.memory_space<vmem>>, vector<1x256x512xbf16>
    %12 = vector.shape_cast %11 : vector<1x256x512xbf16> to vector<256x512xbf16>
    %cst = arith.constant dense<0.000000e+00> : vector<8x512xf32>
    %13 = tpu.matmul %10, %12, %cst {dimension_numbers = #tpu.dot_dimension_numbers<[1], [0], [0], [1], [0, 0, 1, 1], [], []>} : vector<8x256xbf16>, vector<256x512xbf16>, vector<8x512xf32> -> vector<8x512xf32>
    %14 = arith.addf %9, %13 : vector<8x512xf32>
    %c0_13 = arith.constant 0 : index
    %c0_14 = arith.constant 0 : index
    %c0_15 = arith.constant 0 : index
    %15 = vector.load %arg6[%c0_13, %c0_14, %c0_15] : memref<1x1x512xf32, #tpu.memory_space<vmem>>, vector<1x1x512xf32>
    %16 = vector.shape_cast %15 : vector<1x1x512xf32> to vector<1x512xf32>
    %17 = vector.broadcast %16 : vector<1x512xf32> to vector<8x512xf32>
    %18 = arith.addf %14, %17 : vector<8x512xf32>
    %19 = vector.extract_strided_slice %18 {offsets = [0, 0], sizes = [8, 128], strides = [1, 1]} : vector<8x512xf32> to vector<8x128xf32>
    %20 = arith.negf %19 : vector<8x128xf32>
    %21 = math.exp %20 : vector<8x128xf32>
    %cst_16 = arith.constant 1.000000e+00 : f32
    %22 = vector.broadcast %cst_16 : f32 to vector<8x128xf32>
    %23 = arith.addf %22, %21 : vector<8x128xf32>
    %24 = arith.divf %22, %23 : vector<8x128xf32>
    %25 = vector.extract_strided_slice %18 {offsets = [0, 128], sizes = [8, 128], strides = [1, 1]} : vector<8x512xf32> to vector<8x128xf32>
    %26 = arith.negf %25 : vector<8x128xf32>
    %27 = math.exp %26 : vector<8x128xf32>
    %cst_17 = arith.constant 1.000000e+00 : f32
    %28 = vector.broadcast %cst_17 : f32 to vector<8x128xf32>
    %29 = arith.addf %28, %27 : vector<8x128xf32>
    %30 = arith.divf %28, %29 : vector<8x128xf32>
    %31 = vector.extract_strided_slice %18 {offsets = [0, 256], sizes = [8, 128], strides = [1, 1]} : vector<8x512xf32> to vector<8x128xf32>
    %32 = arith.negf %31 : vector<8x128xf32>
    %33 = math.exp %32 : vector<8x128xf32>
    %cst_18 = arith.constant 1.000000e+00 : f32
    %34 = vector.broadcast %cst_18 : f32 to vector<8x128xf32>
    %35 = arith.addf %34, %33 : vector<8x128xf32>
    %36 = arith.divf %34, %35 : vector<8x128xf32>
    %37 = vector.extract_strided_slice %18 {offsets = [0, 384], sizes = [8, 128], strides = [1, 1]} : vector<8x512xf32> to vector<8x128xf32>
    %38 = math.tanh %37 : vector<8x128xf32>
    %c0_19 = arith.constant 0 : index
    %c0_20 = arith.constant 0 : index
    %c0_21 = arith.constant 0 : index
    %39 = vector.load %arg4[%c0_19, %c0_20, %c0_21] : memref<1x8x128xf32, #tpu.memory_space<vmem>>, vector<1x8x128xf32>
    %40 = vector.shape_cast %39 : vector<1x8x128xf32> to vector<8x128xf32>
    %41 = arith.mulf %40, %30 : vector<8x128xf32>
    %42 = arith.mulf %38, %24 : vector<8x128xf32>
    %43 = arith.addf %41, %42 : vector<8x128xf32>
    %44 = math.tanh %43 : vector<8x128xf32>
    %45 = arith.mulf %44, %36 : vector<8x128xf32>
    %46 = arith.truncf %45 : vector<8x128xf32> to vector<8x128xbf16>
    %c0_22 = arith.constant 0 : index
    %c0_23 = arith.constant 0 : index
    %c0_24 = arith.constant 0 : index
    %47 = vector.load %arg7[%c0_22, %c0_23, %c0_24] : memref<1x8x128xbf16, #tpu.memory_space<vmem>>, vector<1x8x128xbf16>
    %48 = vector.shape_cast %47 : vector<1x8x128xbf16> to vector<8x128xbf16>
    %49 = vector.shape_cast %46 : vector<8x128xbf16> to vector<1x8x128xbf16>
    tpu.vector_store %arg7[%c0_22, %c0_23, %c0_24], %49 {strides = array<i32>} : memref<1x8x128xbf16, #tpu.memory_space<vmem>>, vector<1x8x128xbf16>,
    %c0_25 = arith.constant 0 : index
    %c0_26 = arith.constant 0 : index
    %c0_27 = arith.constant 0 : index
    %50 = vector.load %arg8[%c0_25, %c0_26, %c0_27] : memref<1x8x128xf32, #tpu.memory_space<vmem>>, vector<1x8x128xf32>
    %51 = vector.shape_cast %50 : vector<1x8x128xf32> to vector<8x128xf32>
    %52 = vector.shape_cast %43 : vector<8x128xf32> to vector<1x8x128xf32>
    tpu.vector_store %arg8[%c0_25, %c0_26, %c0_27], %52 {strides = array<i32>} : memref<1x8x128xf32, #tpu.memory_space<vmem>>, vector<1x8x128xf32>,
    %53 = arith.truncf %45 : vector<8x128xf32> to vector<8x128xbf16>
    %c0_28 = arith.constant 0 : index
    %c0_29 = arith.constant 0 : index
    %54 = vector.load %arg9[%c0_28, %c0_29] : memref<8x256xbf16, #tpu.memory_space<vmem>>, vector<8x128xbf16>
    tpu.vector_store %arg9[%c0_28, %c0_29], %53 {strides = array<i32>} : memref<8x256xbf16, #tpu.memory_space<vmem>>, vector<8x128xbf16>,
    return
  }
  func.func @transform_0(%arg0: i32) -> (i32, i32) {
    %c0_i32 = arith.constant 0 : i32
    %c0_i32_0 = arith.constant 0 : i32
    %c0_i32_1 = arith.constant 0 : i32
    return %c0_i32, %c0_i32_0 : i32, i32
  }
  func.func @transform_1(%arg0: i32) -> (i32, i32) {
    %c0_i32 = arith.constant 0 : i32
    %c0_i32_0 = arith.constant 0 : i32
    %c0_i32_1 = arith.constant 0 : i32
    return %c0_i32, %c0_i32_0 : i32, i32
  }
  func.func @transform_2(%arg0: i32) -> (i32, i32, i32) {
    %c0_i32 = arith.constant 0 : i32
    %c0_i32_0 = arith.constant 0 : i32
    %c0_i32_1 = arith.constant 0 : i32
    return %arg0, %c0_i32, %c0_i32_0 : i32, i32, i32
  }
  func.func @transform_3(%arg0: i32) -> (i32, i32, i32) {
    %c0_i32 = arith.constant 0 : i32
    %c0_i32_0 = arith.constant 0 : i32
    %c0_i32_1 = arith.constant 0 : i32
    return %arg0, %c0_i32, %c0_i32_0 : i32, i32, i32
  }
  func.func @transform_4(%arg0: i32) -> (i32, i32, i32) {
    %c0_i32 = arith.constant 0 : i32
    %c0_i32_0 = arith.constant 0 : i32
    %c0_i32_1 = arith.constant 0 : i32
    return %arg0, %c0_i32, %c0_i32_0 : i32, i32, i32
  }
  func.func @transform_5(%arg0: i32) -> (i32, i32, i32) {
    %c0_i32 = arith.constant 0 : i32
    %c0_i32_0 = arith.constant 0 : i32
    %c0_i32_1 = arith.constant 0 : i32
    return %arg0, %c0_i32, %c0_i32_0 : i32, i32, i32
  }
  func.func @transform_6(%arg0: i32) -> (i32, i32, i32) {
    %c0_i32 = arith.constant 0 : i32
    %c0_i32_0 = arith.constant 0 : i32
    %c0_i32_1 = arith.constant 0 : i32
    return %arg0, %c0_i32, %c0_i32_0 : i32, i32, i32
  }
  func.func @transform_7(%arg0: i32) -> (i32, i32, i32) {
    %c0_i32 = arith.constant 0 : i32
    %c0_i32_0 = arith.constant 0 : i32
    %c0_i32_1 = arith.constant 0 : i32
    return %arg0, %c0_i32, %c0_i32_0 : i32, i32, i32
  }
}

</mosaic_0001>

<bundles_post_ra>
// kernel: tpu_custom_call.1
= control target key start
LH: loop header
LB: loop body
LE: loop exit
PB: predicated region body
PF: predicated region fallthrough
CT: control target
= control target key end

     0   :  { %s2567_s0 = inlined_call_operand.hbm [shape: bf16[8,128], index: 0, kind: input, shape index: {}]   ;;  %s2568_s1 = inlined_call_operand.hbm [shape: bf16[128,512], index: 1, kind: input, shape index: {}]   ;;  %s2569_s2 = inlined_call_operand.hbm [shape: bf16[2,8,128], index: 2, kind: input, shape index: {}]   ;;  %s2570_s3 = inlined_call_operand.hbm [shape: f32[2,8,128], index: 3, kind: input, shape index: {}]   ;;  %s2571_s4 = inlined_call_operand.hbm [shape: bf16[2,256,512], index: 4, kind: input, shape index: {}]   ;;  %s2572_s5 = inlined_call_operand.vmem [shape: f32[2,1,512], index: 5, kind: input, shape index: {}]   ;;  %s2573_s6 = inlined_call_operand.hbm [shape: bf16[2,8,128], index: 6, kind: output, shape index: {0}]   ;;  %s2574_s7 = inlined_call_operand.hbm [shape: f32[2,8,128], index: 7, kind: output, shape index: {1}]  }
   0x1   :  { %2592 = sst [smem:[#allocation25_spill]] %s2567_s0 }
   0x2   :  { %2593 = sst [smem:[#allocation26_spill]] %s2569_s2 }
   0x3   :  { %13 = vsyncpa [#allocation5], 0 }
   0x4   :  { %14 = vsyncpa [#allocation8], 0 }
   0x5   :  { %15 = vsyncpa [#allocation6], 0 }
   0x6   :  { %17 = vsyncpa [#allocation6 + $0x1], 0 }
   0x7   :  { %18 = vsyncpa [#allocation14], 0 }
   0x8   :  { %20 = vsyncpa [#allocation14 + $0x1], 0  ;;  %s2139_s24 = smov 0   ;;  %s2141_s25 = smov 0  }
   0x9   :  { %s2143_s26 = smov 0   ;;  %s2145_s27 = smov 0  }
   0xa LB: > { %2594 = sst [smem:[#allocation20_spill]] %s2074_s24  ;;  %s2160_s28 = sadd.s32 4294967295, %s2086_s27   ;;  %s2086_s27 = sphi %s2145_s27, %s2635_s27   ;;  %s2082_s26 = sphi %s2143_s26, %s2637_s26   ;;  %s2078_s25 = sphi %s2141_s25, %s2639_s25   ;;  %s2074_s24 = sphi %s2139_s24, %s2638_s24  }
   0xb   : > { %2595 = sst [smem:[#allocation21_spill]] %s2082_s26  ;;  %s1455_s29 = sadd.s32 4294967294, %s2086_s27  }
   0xc   : > { %s2164_s30 = sadd.s32 1, %s2086_s27   ;;  %s75_s8 = sadd.s32 1, %s2082_s26 }
   0xd   : > { %2596 = sst [smem:[#allocation22_spill]] %s2164_s30  ;;  %s72_s9 = ssub.s32 %s2086_s27, %s2164_s30 }
   0xe   : > { %p2575_p0 = scmp.ne.s32.totalorder %s2082_s26, %s2078_s25  ;;  %p73_p1 = scmp.eq.s32.totalorder %s72_s9, 0 }
   0xf   : > { %p88_p2 = scmp.ne.s32.totalorder %s2078_s25, %s2074_s24  ;;  %p2576_p3 = scmp.eq.s32.totalorder %s2160_s28, 0 }
  0x10   : > { %p190_p4 = scmp.eq.s32.totalorder %s2160_s28, 1  ;;  %p196_p7 = scmp.eq.s32.totalorder %s1455_s29, 1 }
  0x11   : > { %s2176_s10 = scalar_select %p73_p1, %s2082_s26, %s75_s8  }
  0x12   : > { %p2180_p5 = por %p2576_p3, %p88_p2  ;;  %p2187_p6 = por %p190_p4, %p2575_p0 }
  0x13   : > { %2597 = sst [smem:[#allocation23_spill]] %s2176_s10  ;;  %p1456_p8 = scmp.ge.s32.totalorder %s2086_s27, 1 }
  0x14   : > { %s2598_s11 = scalar_select %p2180_p5, 1, 0 }
  0x15   : > { %s2599_s12 = scalar_select %p2187_p6, 1, 0 }
  0x16   : > { %p229_p9 = scmp.lt.s32.totalorder %s2086_s27, 3  ;;  %p2194_p11 = por %p196_p7, %p88_p2 }
  0x17   : > { %s2088_s15 = smov [#allocation4]   ;;  %p83_p4 = scmp.eq.s32.totalorder %s2086_s27, 0 }
  0x18   : > { %s2600_s13 = scalar_select %p2194_p11, 1, 0 }
  0x19   : > { %p2198_p12 = pnand %p1456_p8, %p229_p9  ;;  %s242_s16 = sshll.u32 %s2088_s15, 4  ;;  %s243_s16 = int_to_ptr.vmem [resolvable:$true] %s242_s16 }
  0x1a   : > { %2601 = sst [smem:[#allocation24_spill]] %s2600_s13  ;;  %p2604_p2 = scmp.ne.s32.totalorder %s2082_s26, %s2078_s25 }
  0x1b   : > { %s2602_s14 = scalar_select %p2198_p12, 1, 0 }
  0x1c   : > { %p1604_p1 = pneg %p2198_p12  ;;  %p2217_p7 = por %p83_p4, %p2604_p2 }
  0x1d   : > { %s2222_s20 = sand.u32 1, %s2082_s26   ;;  %s2606_s0 = sld [smem:[#allocation25_spill]] }
  0x1e   : > { %p2210_p10 = pnand %p1604_p1, %p2576_p3  ;;  %s1460_s21 = sshll.u32 %s2222_s20, 2 }
  0x1f   : > { %s2605_s19 = scalar_select %p2217_p7, 1, 0 }
  0x20   : > { %s2603_s18 = scalar_select %p2210_p10, 1, 0 }
  0x21   : > { %p2580_p9 = pneg %p2210_p10 }
  0x23   : > { %s1834_s29 = scalar_lea.hbm %s2606_s0, 64 }
  0x24   : > { %p1835_p8 = scmp.ne.s32.totalorder %s2606_s0, %s1834_s29  ;;  %p1841_p2 = scmp.lt.u32.totalorder %s1834_s29, %s2606_s0 }
  0x26   : > { %p1837_p1 = pnand %p2580_p9, %p1835_p8 }
  0x28   : > { %p1838_p4 = pneg %p1837_p1 }
  0x2a   : > { %p1843_p13 = pnand %p1841_p2, %p1838_p4 }
  0x2c   : > { %1846 = shalt.err (!%p1843_p13)
}
  0x2d   : > { %s1847_s10 = scalar_lea.vmem %s243_s16, 64  ;;  %p1855_p6 = scmp.lt.s32.totalorder %s243_s16, %s243_s16 }
  0x2e   : > { %p1848_p3 = scmp.ne.s32.totalorder %s243_s16, %s1847_s10  ;;  %p1856_p5 = scmp.lt.s32.totalorder %s1847_s10, %s1847_s10 }
  0x30   : > { %p1850_p0 = pnand %p1848_p3, %p2580_p9  ;;  %p1857_p12 = por %p1856_p5, %p1855_p6 }
  0x32   : > { %p1851_p11 = pneg %p1850_p0 }
  0x34   : > { %p1858_p7 = pnand %p1857_p12, %p1851_p11 }
  0x36   : > { %1861 = shalt.err (!%p1858_p7)
}
  0x37   : > { %1607 = dma.hbm_to_vmem [thread:$0]  (!%p2210_p10), %s2606_s0, 64, %s243_s16, [#allocation5]  }
  0x38   : > { %s1461_s17 = sshll.u32 %s2086_s27, 6  ;;  %s2607_s2 = sld [smem:[#allocation26_spill]] }
  0x39   : > { %s270_s9 = scalar_lea.vmem [#allocation9], %s1460_s21  ;;  %p2608_p0 = scmp.ne.s32.totalorder %s2605_s19, 0 }
  0x3a   : > { %s277_s15 = sshll.u32 %s270_s9, 4  ;;  %p2609_p3 = scmp.lt.s32.totalorder %s2086_s27, 2  ;;  %s2253_s15 = int_to_ptr.vmem [resolvable:$true] %s277_s15 }
  0x3b   : > { %s2611_s29 = sand.u32 1, %s2086_s27  }
  0x3c   : > { %p2259_p5 = pnand %p2609_p3, %p2608_p0 }
  0x3e   : > { %s2251_s10 = scalar_lea.hbm %s2607_s2, %s1461_s17  ;;  %s2267_s17 = scalar_lea.sflag [#allocation5], %s2611_s29 }
  0x3f   : > { %s2610_s22 = scalar_select %p2259_p5, 1, 0 }
  0x40   : > { %s1862_s8 = scalar_lea.hbm %s2251_s10, 64  ;;  %p2273_p11 = pneg %p2259_p5 }
  0x41   : > { %p1863_p6 = scmp.ne.s32.totalorder %s2251_s10, %s1862_s8  ;;  %s1867_s0 = scalar_lea.hbm %s2607_s2, 128 }
  0x42   : > { %s2612_s21 = scalar_select %p2273_p11, 1, 0 }
  0x43   : > { %p1865_p12 = pnand %p2273_p11, %p1863_p6  ;;  %p1868_p7 = scmp.lt.u32.totalorder %s2251_s10, %s2607_s2 }
  0x44   : > { %p1869_p8 = scmp.lt.u32.totalorder %s1867_s0, %s1862_s8  ;;  %p1871_p4 = scmp.lt.u32.totalorder %s1862_s8, %s2251_s10 }
  0x45   : > { %p1866_p13 = pneg %p1865_p12 }
  0x46   : > { %p1870_p1 = por %p1869_p8, %p1868_p7 }
  0x48   : > { %p1872_p2 = por %p1871_p4, %p1870_p1 }
  0x4a   : > { %p1873_p0 = pnand %p1872_p2, %p1866_p13 }
  0x4c   : > { %1876 = shalt.err (!%p1873_p0)
}
  0x4d   : > { %s1877_s29 = scalar_lea.vmem %s2253_s15, 64  ;;  %s2089_s19 = smov [#allocation9]  }
  0x4e   : > { %p1878_p3 = scmp.ne.s32.totalorder %s2253_s15, %s1877_s29  ;;  %s1882_s9 = sshll.u32 %s2089_s19, 4  ;;  %s1883_s9 = int_to_ptr.vmem [resolvable:$false] %s1882_s9 }
  0x4f   : > { %s1884_s16 = scalar_lea.vmem %s1883_s9, 128  ;;  %p1885_p9 = scmp.lt.s32.totalorder %s2253_s15, %s1883_s9 }
  0x50   : > { %p1880_p6 = pnand %p1878_p3, %p2273_p11  ;;  %p1886_p10 = scmp.lt.s32.totalorder %s1884_s16, %s1877_s29 }
  0x52   : > { %p1881_p12 = pneg %p1880_p6  ;;  %p1887_p7 = por %p1886_p10, %p1885_p9 }
  0x54   : > { %p1888_p8 = pnand %p1887_p7, %p1881_p12 }
  0x56   : > { %1891 = shalt.err (!%p1888_p8)
}
  0x57   : > { %1614 = dma.hbm_to_vmem [thread:$0]  (!%p2259_p5), %s2251_s10, 64, %s2253_s15, %s2267_s17  }
  0x58   : > { %s2613_s0 = sshll.u32 %s2222_s20, 9  ;;  %s1463_s19 = sshll.u32 %s2086_s27, 7 }
  0x59   : > { %s2299_s23 = scalar_lea.vmem [#allocation11], %s2613_s0  ;;  %s2614_s29 = sshll.u32 %s2222_s20, 3 }
  0x5a   : > { %s288_s9 = scalar_lea.vmem [#allocation10], %s2614_s29  ;;  %s293_s30 = scalar_lea.hbm %s2570_s3, %s1463_s19 }
  0x5b   : > { %s295_s16 = sshll.u32 %s288_s9, 4  ;;  %s1892_s13 = scalar_lea.hbm %s293_s30, 128  ;;  %s296_s16 = int_to_ptr.vmem [resolvable:$true] %s295_s16 }
  0x5c   : > { %p1893_p10 = scmp.ne.s32.totalorder %s293_s30, %s1892_s13  ;;  %s1897_s0 = scalar_lea.hbm %s2570_s3, 256 }
  0x5d   : > { %p1898_p1 = scmp.lt.u32.totalorder %s293_s30, %s2570_s3  ;;  %p1899_p4 = scmp.lt.u32.totalorder %s1897_s0, %s1892_s13 }
  0x5e   : > { %p1895_p9 = pnand %p1893_p10, %p2273_p11  ;;  %p1901_p0 = scmp.lt.u32.totalorder %s1892_s13, %s293_s30 }
  0x5f   : > { %p1900_p2 = por %p1899_p4, %p1898_p1 }
  0x60   : > { %p1896_p13 = pneg %p1895_p9 }
  0x61   : > { %p1902_p3 = por %p1901_p0, %p1900_p2 }
  0x63   : > { %p1903_p6 = pnand %p1902_p3, %p1896_p13 }
  0x65   : > { %1906 = shalt.err (!%p1903_p6)
}
  0x66   : > { %s1907_s2 = scalar_lea.vmem %s296_s16, 128  ;;  %s2090_s26 = smov [#allocation10]  }
  0x67   : > { %p1908_p12 = scmp.ne.s32.totalorder %s296_s16, %s1907_s2  ;;  %s1912_s20 = sshll.u32 %s2090_s26, 4  ;;  %s1913_s20 = int_to_ptr.vmem [resolvable:$false] %s1912_s20 }
  0x68   : > { %s1914_s19 = scalar_lea.vmem %s1913_s20, 256  ;;  %p1915_p10 = scmp.lt.s32.totalorder %s296_s16, %s1913_s20 }
  0x69   : > { %p1910_p7 = pnand %p1908_p12, %p2273_p11  ;;  %p1916_p9 = scmp.lt.s32.totalorder %s1914_s19, %s1907_s2 }
  0x6b   : > { %p1911_p8 = pneg %p1910_p7  ;;  %p1917_p5 = por %p1916_p9, %p1915_p10 }
  0x6d   : > { %p1918_p1 = pnand %p1917_p5, %p1911_p8 }
  0x6f   : > { %1921 = shalt.err (!%p1918_p1)
}
  0x70   : > { %p2615_p4 = scmp.ne.s32.totalorder %s2610_s22, 0  ;;  %s2091_s24 = smov [#allocation7]  }
  0x71   : > { %s252_s13 = sshll.u32 %s2091_s24, 4  ;;  %s1585_s8 = sshll.u32 %s2086_s27, 13  ;;  %s253_s13 = int_to_ptr.vmem [resolvable:$true] %s252_s13 }
  0x72   : > { %1617 = dma.hbm_to_vmem [thread:$0]  (!%p2615_p4), %s293_s30, 128, %s296_s16, %s2267_s17  }
  0x73   : > { %s1922_s10 = scalar_lea.hbm %s2568_s1, 4096  ;;  %p2616_p5 = scmp.ne.s32.totalorder %s2603_s18, 0 }
  0x74   : > { %p1923_p13 = scmp.ne.s32.totalorder %s2568_s1, %s1922_s10  ;;  %p1929_p6 = scmp.lt.u32.totalorder %s1922_s10, %s2568_s1 }
  0x75   : > { %p2617_p2 = pneg %p2616_p5 }
  0x77   : > { %p1925_p0 = pnand %p1923_p13, %p2617_p2 }
  0x79   : > { %p1926_p3 = pneg %p1925_p0 }
  0x7b   : > { %p1931_p12 = pnand %p1929_p6, %p1926_p3 }
  0x7d   : > { %1934 = shalt.err (!%p1931_p12)
}
  0x7e   : > { %s1935_s30 = scalar_lea.vmem %s253_s13, 4096  ;;  %p2618_p8 = pmov %p2617_p2 }
  0x7f   : > { %p1936_p7 = scmp.ne.s32.totalorder %s253_s13, %s1935_s30  ;;  %p1943_p1 = scmp.lt.s32.totalorder %s253_s13, %s253_s13 }
  0x80   : > { %p1944_p4 = scmp.lt.s32.totalorder %s1935_s30, %s1935_s30 }
  0x81   : > { %p1938_p10 = pnand %p1936_p7, %p2618_p8 }
  0x82   : > { %p1945_p11 = por %p1944_p4, %p1943_p1 }
  0x83   : > { %p1939_p9 = pneg %p1938_p10 }
  0x85   : > { %p1946_p2 = pnand %p1945_p11, %p1939_p9 }
  0x87   : > { %1949 = shalt.err (!%p1946_p2)
}
  0x88   : > { %s2092_s16 = smov 256   ;;  %s2093_s20 = smov 16  }
  0x89   : > { %1610 = dma.hbm_to_vmem [thread:$0]  (!%p2616_p5), %s2568_s1, 4096, %s253_s13, [#allocation8], %s2092_s16, %s2092_s16, %s2093_s20  }
  0x8a   : > { %s2348_s10 = scalar_lea.hbm %s2571_s4, %s1585_s8  ;;  %s2619_s15 = sshll.u32 %s2299_s23, 4  ;;  %s2352_s15 = int_to_ptr.vmem [resolvable:$true] %s2619_s15 }
  0x8b   : > { %s1950_s18 = scalar_lea.hbm %s2348_s10, 8192  ;;  %p2620_p4 = scmp.ne.s32.totalorder %s2612_s21, 0 }
  0x8c   : > { %p1951_p11 = scmp.ne.s32.totalorder %s2348_s10, %s1950_s18  ;;  %s1955_s13 = scalar_lea.hbm %s2571_s4, 16384 }
  0x8d   : > { %p1956_p5 = scmp.lt.u32.totalorder %s2348_s10, %s2571_s4  ;;  %p1957_p3 = scmp.lt.u32.totalorder %s1955_s13, %s1950_s18 }
  0x8e   : > { %p1953_p13 = pnand %p1951_p11, %p2620_p4  ;;  %p1959_p12 = scmp.lt.u32.totalorder %s1950_s18, %s2348_s10 }
  0x8f   : > { %p1958_p6 = por %p1957_p3, %p1956_p5 }
  0x90   : > { %p1954_p0 = pneg %p1953_p13 }
  0x91   : > { %p1960_p7 = por %p1959_p12, %p1958_p6 }
  0x93   : > { %p1961_p8 = pnand %p1960_p7, %p1954_p0 }
  0x95   : > { %1964 = shalt.err (!%p1961_p8)
}
  0x96   : > { %s1965_s23 = scalar_lea.vmem %s2352_s15, 8192  ;;  %s2094_s8 = smov [#allocation11]  }
  0x97   : > { %p1966_p10 = scmp.ne.s32.totalorder %s2352_s15, %s1965_s23  ;;  %s1970_s19 = sshll.u32 %s2094_s8, 4  ;;  %s1971_s19 = int_to_ptr.vmem [resolvable:$false] %s1970_s19 }
  0x98   : > { %s1972_s24 = scalar_lea.vmem %s1971_s19, 16384  ;;  %p1973_p2 = scmp.lt.s32.totalorder %s2352_s15, %s1971_s19 }
  0x99   : > { %p1968_p9 = pnand %p1966_p10, %p2620_p4  ;;  %p1974_p11 = scmp.lt.s32.totalorder %s1972_s24, %s1965_s23 }
  0x9b   : > { %p1969_p1 = pneg %p1968_p9  ;;  %p1975_p13 = por %p1974_p11, %p1973_p2 }
  0x9d   : > { %p1976_p5 = pnand %p1975_p13, %p1969_p1 }
  0x9f   : > { %1979 = shalt.err (!%p1976_p5)
}
  0xa0   : > { %p2621_p0 = scmp.ne.s32.totalorder %s2610_s22, 0  ;;  %p2622_p4 = scmp.ne.s32.totalorder %s2602_s14, 0 }
  0xa1   : > { %p2623_p3 = scmp.eq.s32.totalorder (!%p2622_p4), %s2160_s28, 0 }
  0xa2   : > { %1620 = dma.hbm_to_vmem [thread:$0]  (!%p2621_p0), %s2348_s10, 8192, %s2352_s15, %s2267_s17, %s2092_s16, %s2092_s16, %s2093_s20  }
  0xa3   : > { %332 = sbr.rel (%p2622_p4) target bundleno = 792 (0x318), region = 44 }
  0xaa   : > { %2053 = dma.done.wait (%p2623_p3), [#allocation5], 64   ;;  %p2624_p6 = pmov %p2623_p3 }
  0xab   : > { %p2625_p12 = pmov %p2623_p3 }
  0xac   : > { %2055 = vsyncadd (%p2624_p6), [#allocation5], 4294967232 }
  0xad   : > { %2057 = dma.done.wait (%p2625_p12), [#allocation8], 4096   ;;  %p2626_p7 = pmov %p2623_p3 }
  0xae   : > { %s342_s22 = sand.u32 1, %s2160_s28   ;;  %s2391_s17 = sand.u32 1, %s2078_s25  }
  0xaf   : > { %2059 = vsyncadd (%p2626_p7), [#allocation8], 4294963200  ;;  %s1470_s14 = sshll.u32 %s2391_s17, 2  ;;  %s343_s21 = scalar_lea.sflag [#allocation5], %s342_s22 }
  0xb0   : > { %s346_s16 = scalar_lea.vmem [#allocation9], %s1470_s14  ;;  %p2627_p8 = scmp.ne.s32.totalorder %s2598_s11, 0 }
  0xb2   : > { %2061 = dma.done.wait (%p2627_p8), %s343_s21, 8384  }
  0xb3   : > { %2063 = vsyncadd (%p2627_p8), %s343_s21, 4294958912  ;;  %s1471_s20 = sshll.u32 %s2391_s17, 3  ;;  %s1472_s29 = sshll.u32 %s2391_s17, 9  ;;  %v419_v0 = vld [vmem:[%s346_s16] sm:$0xf] }
  0xb4   : > { %p414_p10 = scmp.lt.s32.totalorder %s2160_s28, 1  ;;  %420 = vst [vmem:[#allocation2 + $0x4] sm:$0xf] %v419_v0  ;;  %s2407_s2 = scalar_lea.vmem [#allocation10], %s1471_s20 }
  0xb5   : > { %s2409_s11 = scalar_lea.vmem [#allocation11], %s1472_s29  ;;  %s2411_s13 = scalar_lea.vmem [#allocation12], %s1470_s14 }
  0xb6   : > { %s415_s9 = scalar_select %p414_p10, %s2160_s28, 1 }
  0xb7   : > { %s2413_s26 = scalar_lea.vmem [#allocation13], %s1471_s20  ;;  %p2628_p9 = scmp.ne.s32.totalorder %s2160_s28, 0 }
  0xb8   : > { %s1475_s10 = sshll.u32 %s415_s9, 2  ;;  %v1672_v1 = vld [vmem:[#allocation7 + $0x4] ss:$16 sps:$4 sm:$0xff] (!%p2628_p9)   ;;  %v1674_v2 = vld [vmem:[#allocation7 + $0xc] ss:$16 sps:$4 sm:$0xff] (!%p2628_p9)   ;;  %v2095_v3 = vmov (!%p2628_p9), 0  }
  0xb9   : > { %s2405_s0 = scalar_lea.vmem %s2572_s5, %s1475_s10  ;;  %424 = sbr.rel (%p2628_p9) target bundleno = 433 (0x1b1), region = 68  ;;  %425 = vst [vmem:[#allocation2] sm:$0xf] (!%p2628_p9), %v2095_v3  ;;  %651 = vmatprep.mubr.bf16.mxu0 (!%p2628_p9), %v2095_v3  ;;  %692 = vmatprep.mubr.bf16.mxu1 (!%p2628_p9), %v2095_v3  ;;  %v1676_v4 = vld [vmem:[#allocation7] ss:$16 sps:$4 sm:$0xff] (!%p2628_p9)  }
  0xba   : > { %619 = vmatprep.subr.bf16.mxu0 (!%p2628_p9), %v1672_v1  ;;  %v1677_v5 = vld [vmem:[#allocation7 + $0x8] ss:$16 sps:$4 sm:$0xff] (!%p2628_p9)   ;;  %660 = vmatprep.subr.bf16.mxu1 (!%p2628_p9), %v1674_v2  ;;  %v1678_v6 = vld [vmem:[#allocation7 + $0x24] ss:$16 sps:$4 sm:$0xff] (!%p2628_p9)   ;;  %v1680_v7 = vld [vmem:[#allocation7 + $0x2c] ss:$16 sps:$4 sm:$0xff] (!%p2628_p9)  }
  0xbb   : > { %620 = vmatpush1.bf16.msra.mxu0 (!%p2628_p9), %v1676_v4  ;;  %661 = vmatpush1.bf16.msra.mxu1 (!%p2628_p9), %v1677_v5  ;;  %v1682_v8 = vld [vmem:[#allocation7 + $0x20] ss:$16 sps:$4 sm:$0xff] (!%p2628_p9)   ;;  %v1683_v9 = vld [vmem:[#allocation7 + $0x28] ss:$16 sps:$4 sm:$0xff] (!%p2628_p9)   ;;  %v1684_v10 = vld [vmem:[#allocation7 + $0x44] ss:$16 sps:$4 sm:$0xff] (!%p2628_p9)  }
  0xbc   : > { %621 = vmatprep.subr.bf16.mxu0 (!%p2628_p9), %v1678_v6  ;;  %662 = vmatprep.subr.bf16.mxu1 (!%p2628_p9), %v1680_v7  ;;  %v1686_v11 = vld [vmem:[#allocation7 + $0x4c] ss:$16 sps:$4 sm:$0xff] (!%p2628_p9)   ;;  %v1688_v12 = vld [vmem:[#allocation7 + $0x40] ss:$16 sps:$4 sm:$0xff] (!%p2628_p9)   ;;  %v1689_v13 = vld [vmem:[#allocation7 + $0x48] ss:$16 sps:$4 sm:$0xff] (!%p2628_p9)  }
  0xbd   : > { %v1690_v14 = vld [vmem:[#allocation7 + $0x64] ss:$16 sps:$4 sm:$0xff] (!%p2628_p9)   ;;  %v1692_v15 = vld [vmem:[#allocation7 + $0x6c] ss:$16 sps:$4 sm:$0xff] (!%p2628_p9)   ;;  %v1694_v16 = vld [vmem:[#allocation7 + $0x60] ss:$16 sps:$4 sm:$0xff] (!%p2628_p9)  }
  0xbe   : > { %v1695_v17 = vld [vmem:[#allocation7 + $0x68] ss:$16 sps:$4 sm:$0xff] (!%p2628_p9)   ;;  %v1696_v18 = vld [vmem:[#allocation7 + $0x84] ss:$16 sps:$4 sm:$0xff] (!%p2628_p9)   ;;  %v1698_v19 = vld [vmem:[#allocation7 + $0x8c] ss:$16 sps:$4 sm:$0xff] (!%p2628_p9)  }
  0xbf   : > { %622 = vmatpush1.bf16.msra.mxu0 (!%p2628_p9), %v1682_v8  ;;  %663 = vmatpush1.bf16.msra.mxu1 (!%p2628_p9), %v1683_v9  ;;  %v1700_v20 = vld [vmem:[#allocation7 + $0x80] ss:$16 sps:$4 sm:$0xff] (!%p2628_p9)   ;;  %v1701_v21 = vld [vmem:[#allocation7 + $0x88] ss:$16 sps:$4 sm:$0xff] (!%p2628_p9)   ;;  %v1702_v22 = vld [vmem:[#allocation7 + $0xa4] ss:$16 sps:$4 sm:$0xff] (!%p2628_p9)  }
  0xc0   : > { %623 = vmatprep.subr.bf16.mxu0 %v1684_v10  ;;  %664 = vmatprep.subr.bf16.mxu1 %v1686_v11  ;;  %v1704_v23 = vld [vmem:[#allocation7 + $0xac] ss:$16 sps:$4 sm:$0xff]   ;;  %v1706_v24 = vld [vmem:[#allocation7 + $0xa0] ss:$16 sps:$4 sm:$0xff]   ;;  %v1707_v25 = vld [vmem:[#allocation7 + $0xa8] ss:$16 sps:$4 sm:$0xff]  }
  0xc1   : > { %v1708_v26 = vld [vmem:[#allocation7 + $0xc4] ss:$16 sps:$4 sm:$0xff]   ;;  %v1710_v27 = vld [vmem:[#allocation7 + $0xcc] ss:$16 sps:$4 sm:$0xff]   ;;  %v1712_v28 = vld [vmem:[#allocation7 + $0xc0] ss:$16 sps:$4 sm:$0xff]  }
  0xc2   : > { %v1713_v29 = vld [vmem:[#allocation7 + $0xc8] ss:$16 sps:$4 sm:$0xff]   ;;  %v1714_v30 = vld [vmem:[#allocation7 + $0xe4] ss:$16 sps:$4 sm:$0xff]   ;;  %v1716_v31 = vld [vmem:[#allocation7 + $0xec] ss:$16 sps:$4 sm:$0xff]  }
  0xc3   : > { %624 = vmatpush1.bf16.msra.mxu0 %v1688_v12  ;;  %665 = vmatpush1.bf16.msra.mxu1 %v1689_v13  ;;  %v1718_v32 = vld [vmem:[#allocation7 + $0xe0] ss:$16 sps:$4 sm:$0xff]   ;;  %v1719_v33 = vld [vmem:[#allocation7 + $0xe8] ss:$16 sps:$4 sm:$0xff]   ;;  %v426_v34 = vld [vmem:[#allocation4] sm:$0xf] }
  0xc4   : > { %625 = vmatprep.subr.bf16.mxu0 %v1690_v14  ;;  %666 = vmatprep.subr.bf16.mxu1 %v1692_v15 }
  0xc7   : > { %626 = vmatpush1.bf16.msra.mxu0 %v1694_v16  ;;  %667 = vmatpush1.bf16.msra.mxu1 %v1695_v17 }
  0xc8   : > { %627 = vmatprep.subr.bf16.mxu0 %v1696_v18  ;;  %668 = vmatprep.subr.bf16.mxu1 %v1698_v19 }
  0xcb   : > { %628 = vmatpush1.bf16.msra.mxu0 %v1700_v20  ;;  %669 = vmatpush1.bf16.msra.mxu1 %v1701_v21 }
  0xcc   : > { %629 = vmatprep.subr.bf16.mxu0 %v1702_v22  ;;  %670 = vmatprep.subr.bf16.mxu1 %v1704_v23 }
  0xcf   : > { %630 = vmatpush1.bf16.msra.mxu0 %v1706_v24  ;;  %671 = vmatpush1.bf16.msra.mxu1 %v1707_v25 }
  0xd0   : > { %631 = vmatprep.subr.bf16.mxu0 %v1708_v26  ;;  %672 = vmatprep.subr.bf16.mxu1 %v1710_v27 }
  0xd3   : > { %632 = vmatpush1.bf16.msra.mxu0 %v1712_v28  ;;  %673 = vmatpush1.bf16.msra.mxu1 %v1713_v29 }
  0xd4   : > { %633 = vmatprep.subr.bf16.mxu0 %v1714_v30  ;;  %674 = vmatprep.subr.bf16.mxu1 %v1716_v31 }
  0xd7   : > { %634 = vmatpush1.bf16.msra.mxu0 %v1718_v32  ;;  %675 = vmatpush1.bf16.msra.mxu1 %v1719_v33 }
  0xda   : > { %652 = vmatmul.mubr.bf16.vlgmr.msra.gmra.mrb[0].mxu0 %v426_v34  ;;  %693 = vmatmul.mubr.bf16.vlgmr.msra.gmra.mrb[0].mxu1 %v426_v34 }
 0x1ad   : > { %v653_v35 = vpop.f32.mrb[0].mxu0  ;;  %v694_v36 = vpop.f32.mrb[0].mxu1 }
 0x1ae   : > { %701 = vst [vmem:[#allocation3] sm:$0xff] %v653_v35  ;;  %703 = vst [vmem:[#allocation3 + $0x10] sm:$0xff] %v694_v36  ;;  %v655_v37 = vpop.f32.mrb[1].mxu0  ;;  %v696_v38 = vpop.f32.mrb[1].mxu1 }
 0x1af   : > { %702 = vst [vmem:[#allocation3 + $0x8] sm:$0xff] %v655_v37  ;;  %704 = vst [vmem:[#allocation3 + $0x18] sm:$0xff] %v696_v38  ;;  %v657_v39 = vpop.f32.mrb[2].mxu0  ;;  %v698_v40 = vpop.f32.mrb[2].mxu1 }
 0x1b0   : > { %v658_v41 = vpop.f32.mrb[3].mxu0  ;;  %v699_v42 = vpop.f32.mrb[3].mxu1 }
 0x1b1 PF: > { %p2629_p1 = scmp.eq.s32.totalorder %s2160_s28, 0 }
 0x1b2   : > { %v2096_v43 = vmov (!%p2629_p1), 0.0  }
 0x1b3   : > { %708 = sbr.rel (%p2629_p1) target bundleno = 442 (0x1ba), region = 72  ;;  %709 = vst [vmem:[#allocation3] sm:$0xff] (!%p2629_p1), %v2096_v43  ;;  %710 = vst [vmem:[#allocation3 + $0x8] sm:$0xff] (!%p2629_p1), %v2096_v43 }
 0x1b4   : > { %711 = vst [vmem:[#allocation3 + $0x10] sm:$0xff] (!%p2629_p1), %v2096_v43  ;;  %712 = vst [vmem:[#allocation3 + $0x18] sm:$0xff] (!%p2629_p1), %v2096_v43 }
 0x1ba PF: > { %v1720_v44 = vld [vmem:[%s2409_s11 + $0x4] ss:$16 sps:$4 sm:$0xff]   ;;  %v1722_v45 = vld [vmem:[%s2409_s11] ss:$16 sps:$4 sm:$0xff]   ;;  %v1731_v49 = vld [vmem:[%s2409_s11 + $0xc] ss:$16 sps:$4 sm:$0xff]  }
 0x1bb   : > { %1109 = vmatprep.subr.bf16.mxu0 %v1720_v44  ;;  %v1723_v46 = vld [vmem:[%s2409_s11 + $0x24] ss:$16 sps:$4 sm:$0xff]   ;;  %v1725_v47 = vld [vmem:[%s2409_s11 + $0x20] ss:$16 sps:$4 sm:$0xff]   ;;  %v1734_v50 = vld [vmem:[%s2409_s11 + $0x8] ss:$16 sps:$4 sm:$0xff]   ;;  %1150 = vmatprep.subr.bf16.mxu1 %v1731_v49 }
 0x1bc   : > { %1110 = vmatpush1.bf16.msra.mxu0 %v1722_v45  ;;  %v1726_v48 = vld [vmem:[%s2409_s11 + $0x44] ss:$16 sps:$4 sm:$0xff]   ;;  %v1728_v51 = vld [vmem:[%s2409_s11 + $0x40] ss:$16 sps:$4 sm:$0xff]   ;;  %1151 = vmatpush1.bf16.msra.mxu1 %v1734_v50  ;;  %v1737_v53 = vld [vmem:[%s2409_s11 + $0x2c] ss:$16 sps:$4 sm:$0xff]  }
 0x1bd   : > { %1111 = vmatprep.subr.bf16.mxu0 %v1723_v46  ;;  %v1729_v52 = vld [vmem:[%s2409_s11 + $0x64] ss:$16 sps:$4 sm:$0xff]   ;;  %v1740_v54 = vld [vmem:[%s2409_s11 + $0x28] ss:$16 sps:$4 sm:$0xff]   ;;  %1152 = vmatprep.subr.bf16.mxu1 %v1737_v53  ;;  %v1733_v55 = vld [vmem:[%s2409_s11 + $0x60] ss:$16 sps:$4 sm:$0xff]  }
 0x1be   : > { %v1735_v56 = vld [vmem:[%s2409_s11 + $0x84] ss:$16 sps:$4 sm:$0xff]   ;;  %v1743_v57 = vld [vmem:[%s2409_s11 + $0x4c] ss:$16 sps:$4 sm:$0xff]   ;;  %v1746_v58 = vld [vmem:[%s2409_s11 + $0x48] ss:$16 sps:$4 sm:$0xff]  }
 0x1bf   : > { %v1749_v59 = vld [vmem:[%s2409_s11 + $0x6c] ss:$16 sps:$4 sm:$0xff]   ;;  %v1739_v60 = vld [vmem:[%s2409_s11 + $0x80] ss:$16 sps:$4 sm:$0xff]   ;;  %v1741_v61 = vld [vmem:[%s2409_s11 + $0xa4] ss:$16 sps:$4 sm:$0xff]  }
 0x1c0   : > { %1112 = vmatpush1.bf16.msra.mxu0 %v1725_v47  ;;  %1153 = vmatpush1.bf16.msra.mxu1 %v1740_v54  ;;  %v1752_v62 = vld [vmem:[%s2409_s11 + $0x68] ss:$16 sps:$4 sm:$0xff]   ;;  %v1755_v63 = vld [vmem:[%s2409_s11 + $0x8c] ss:$16 sps:$4 sm:$0xff]   ;;  %v1745_v0 = vld [vmem:[%s2409_s11 + $0xa0] ss:$16 sps:$4 sm:$0xff]   ;;  %v1197_v47 = vlaneseq }
 0x1c1   : > { %1113 = vmatprep.subr.bf16.mxu0 %v1726_v48  ;;  %1154 = vmatprep.subr.bf16.mxu1 %v1743_v57  ;;  %v1747_v1 = vld [vmem:[%s2409_s11 + $0xc4] ss:$16 sps:$4 sm:$0xff]   ;;  %v1758_v2 = vld [vmem:[%s2409_s11 + $0x88] ss:$16 sps:$4 sm:$0xff]   ;;  %v1761_v3 = vld [vmem:[%s2409_s11 + $0xac] ss:$16 sps:$4 sm:$0xff]  }
 0x1c2   : > { %v1751_v4 = vld [vmem:[%s2409_s11 + $0xc0] ss:$16 sps:$4 sm:$0xff]   ;;  %v1753_v5 = vld [vmem:[%s2409_s11 + $0xe4] ss:$16 sps:$4 sm:$0xff]   ;;  %v1764_v6 = vld [vmem:[%s2409_s11 + $0xa8] ss:$16 sps:$4 sm:$0xff]  }
 0x1c3   : > { %v1767_v7 = vld [vmem:[%s2409_s11 + $0xcc] ss:$16 sps:$4 sm:$0xff]   ;;  %v1757_v8 = vld [vmem:[%s2409_s11 + $0xe0] ss:$16 sps:$4 sm:$0xff]   ;;  %v1759_v9 = vld [vmem:[%s2409_s11 + $0x104] ss:$16 sps:$4 sm:$0xff]  }
 0x1c4   : > { %1114 = vmatpush1.bf16.msra.mxu0 %v1728_v51  ;;  %1155 = vmatpush1.bf16.msra.mxu1 %v1746_v58  ;;  %v1770_v10 = vld [vmem:[%s2409_s11 + $0xc8] ss:$16 sps:$4 sm:$0xff]   ;;  %v1773_v11 = vld [vmem:[%s2409_s11 + $0xec] ss:$16 sps:$4 sm:$0xff]   ;;  %v1763_v12 = vld [vmem:[%s2409_s11 + $0x100] ss:$16 sps:$4 sm:$0xff]  }
 0x1c5   : > { %1115 = vmatprep.subr.bf16.mxu0 %v1729_v52  ;;  %1156 = vmatprep.subr.bf16.mxu1 %v1749_v59  ;;  %v1765_v13 = vld [vmem:[%s2409_s11 + $0x124] ss:$16 sps:$4 sm:$0xff]   ;;  %v1776_v14 = vld [vmem:[%s2409_s11 + $0xe8] ss:$16 sps:$4 sm:$0xff]   ;;  %v1779_v15 = vld [vmem:[%s2409_s11 + $0x10c] ss:$16 sps:$4 sm:$0xff]  }
 0x1c6   : > { %v1769_v16 = vld [vmem:[%s2409_s11 + $0x120] ss:$16 sps:$4 sm:$0xff]   ;;  %v1771_v17 = vld [vmem:[%s2409_s11 + $0x144] ss:$16 sps:$4 sm:$0xff]   ;;  %v1782_v18 = vld [vmem:[%s2409_s11 + $0x108] ss:$16 sps:$4 sm:$0xff]  }
 0x1c7   : > { %v1785_v19 = vld [vmem:[%s2409_s11 + $0x12c] ss:$16 sps:$4 sm:$0xff]   ;;  %v1775_v20 = vld [vmem:[%s2409_s11 + $0x140] ss:$16 sps:$4 sm:$0xff]   ;;  %v1777_v22 = vld [vmem:[%s2409_s11 + $0x164] ss:$16 sps:$4 sm:$0xff]  }
 0x1c8   : > { %1116 = vmatpush1.bf16.msra.mxu0 %v1733_v55  ;;  %1157 = vmatpush1.bf16.msra.mxu1 %v1752_v62  ;;  %v717_v21 = vld [vmem:[#allocation2] sm:$0xff]  ;;  %v1788_v24 = vld [vmem:[%s2409_s11 + $0x128] ss:$16 sps:$4 sm:$0xff]   ;;  %v1783_v27 = vld [vmem:[%s2409_s11 + $0x184] ss:$16 sps:$4 sm:$0xff]   ;;  %v1198_v48 = vshrl.u32 %v1197_v47, 7 }
 0x1c9   : > { %1117 = vmatprep.subr.bf16.mxu0 %v1735_v56  ;;  %1158 = vmatprep.subr.bf16.mxu1 %v1755_v63  ;;  %v1511_v23 = vcombine.high %v717_v21, %v717_v21  ;;  %v1791_v25 = vld [vmem:[%s2409_s11 + $0x14c] ss:$16 sps:$4 sm:$0xff]   ;;  %v1781_v26 = vld [vmem:[%s2409_s11 + $0x160] ss:$16 sps:$4 sm:$0xff]   ;;  %v1794_v28 = vld [vmem:[%s2409_s11 + $0x148] ss:$16 sps:$4 sm:$0xff]   ;;  %v1510_v45 = vcombine.low %v717_v21, %v717_v21 }
 0x1ca   : > { %v1797_v29 = vld [vmem:[%s2409_s11 + $0x16c] ss:$16 sps:$4 sm:$0xff]   ;;  %v1787_v30 = vld [vmem:[%s2409_s11 + $0x180] ss:$16 sps:$4 sm:$0xff]   ;;  %v1789_v31 = vld [vmem:[%s2409_s11 + $0x1a4] ss:$16 sps:$4 sm:$0xff]  }
 0x1cb   : > { %1141 = vmatprep.mubr.bf16.mxu0 %v1511_v23  ;;  %1182 = vmatprep.mubr.bf16.mxu1 %v1511_v23  ;;  %v1800_v32 = vld [vmem:[%s2409_s11 + $0x168] ss:$16 sps:$4 sm:$0xff]   ;;  %v1803_v33 = vld [vmem:[%s2409_s11 + $0x18c] ss:$16 sps:$4 sm:$0xff]   ;;  %v1793_v34 = vld [vmem:[%s2409_s11 + $0x1a0] ss:$16 sps:$4 sm:$0xff]  }
 0x1cc   : > { %1118 = vmatpush1.bf16.msra.mxu0 %v1739_v60  ;;  %1159 = vmatpush1.bf16.msra.mxu1 %v1758_v2  ;;  %v1795_v35 = vld [vmem:[%s2409_s11 + $0x1c4] ss:$16 sps:$4 sm:$0xff]   ;;  %v1806_v36 = vld [vmem:[%s2409_s11 + $0x188] ss:$16 sps:$4 sm:$0xff]   ;;  %v1809_v37 = vld [vmem:[%s2409_s11 + $0x1ac] ss:$16 sps:$4 sm:$0xff]  }
 0x1cd   : > { %1119 = vmatprep.subr.bf16.mxu0 %v1741_v61  ;;  %1160 = vmatprep.subr.bf16.mxu1 %v1761_v3  ;;  %v1799_v38 = vld [vmem:[%s2409_s11 + $0x1c0] ss:$16 sps:$4 sm:$0xff]   ;;  %v1801_v39 = vld [vmem:[%s2409_s11 + $0x1e4] ss:$16 sps:$4 sm:$0xff]   ;;  %v1811_v40 = vld [vmem:[%s2409_s11 + $0x1a8] ss:$16 sps:$4 sm:$0xff]  }
 0x1ce   : > { %v1812_v41 = vld [vmem:[%s2409_s11 + $0x1cc] ss:$16 sps:$4 sm:$0xff]   ;;  %v1805_v42 = vld [vmem:[%s2409_s11 + $0x1e0] ss:$16 sps:$4 sm:$0xff]   ;;  %v1814_v43 = vld [vmem:[%s2409_s11 + $0x1c8] ss:$16 sps:$4 sm:$0xff]  }
 0x1cf   : > { %v1815_v44 = vld [vmem:[%s2409_s11 + $0x1ec] ss:$16 sps:$4 sm:$0xff]   ;;  %v1817_v46 = vld [vmem:[%s2409_s11 + $0x1e8] ss:$16 sps:$4 sm:$0xff]   ;;  %v1199_v49 = vsub.s32 0, %v1198_v48  ;;  %v1203_v51 = vsub.s32 1, %v1198_v48 }
 0x1d0   : > { %1120 = vmatpush1.bf16.msra.mxu0 %v1745_v0  ;;  %1161 = vmatpush1.bf16.msra.mxu1 %v1764_v6  ;;  %v1195_v50 = vld [vmem:[%s2405_s0] sm:$0xf]  ;;  %v713_v52 = vld [vmem:[#allocation3] sm:$0xff]  ;;  %v714_v54 = vld [vmem:[#allocation3 + $0x8] sm:$0xff]  ;;  %v1207_v59 = vsub.s32 2, %v1198_v48  ;;  %s1582_s30 = sshll.u32 %s2160_s28, 7 }
 0x1d1   : > { %1121 = vmatprep.subr.bf16.mxu0 %v1747_v1  ;;  %1162 = vmatprep.subr.bf16.mxu1 %v1767_v7  ;;  %v1200_v53 = vrot.slane %v1195_v50, %v1199_v49  ;;  %v1204_v56 = vrot.slane %v1195_v50, %v1203_v51  ;;  %v715_v0 = vld [vmem:[#allocation3 + $0x10] sm:$0xff]  ;;  %s1282_s23 = sshll.u32 %s2413_s26, 4  ;;  %s2490_s24 = scalar_lea.hbm %s2574_s7, %s1582_s30  ;;  %s2492_s23 = int_to_ptr.vmem [resolvable:$true] %s1282_s23 }
 0x1d2   : > { %v1240_v23 = vld [vmem:[%s2407_s2] sm:$0xff]  ;;  %s1256_s22 = scalar_lea.sflag [#allocation14], %s2391_s17  ;;  %s1980_s14 = scalar_lea.vmem %s2492_s23, 128 }
 0x1d3   : > { %p1981_p2 = scmp.ne.s32.totalorder %s2492_s23, %s1980_s14  ;;  %p2630_p11 = scmp.ne.s32.totalorder %s2599_s12, 0 }
 0x1d4   : > { %1122 = vmatpush1.bf16.msra.mxu0 %v1751_v4  ;;  %1163 = vmatpush1.bf16.msra.mxu1 %v1770_v10  ;;  %v1208_v4 = vrot.slane %v1195_v50, %v1207_v59  ;;  %s2097_s21 = smov [#allocation13]  }
 0x1d5   : > { %1123 = vmatprep.subr.bf16.mxu0 %v1753_v5  ;;  %1164 = vmatprep.subr.bf16.mxu1 %v1773_v11  ;;  %p1982_p13 = pnand %p1981_p2, %p2630_p11  ;;  %s1984_s16 = sshll.u32 %s2097_s21, 4  ;;  %s1985_s16 = int_to_ptr.vmem [resolvable:$false] %s1984_s16 }
 0x1d6   : > { %s1986_s20 = scalar_lea.vmem %s1985_s16, 256  ;;  %p1987_p0 = scmp.lt.s32.totalorder %s2492_s23, %s1985_s16 }
 0x1d7   : > { %p1983_p5 = pneg %p1982_p13  ;;  %p1988_p4 = scmp.lt.s32.totalorder %s1986_s20, %s1980_s14 }
 0x1d8   : > { %1124 = vmatpush1.bf16.msra.mxu0 %v1757_v8  ;;  %1165 = vmatpush1.bf16.msra.mxu1 %v1776_v14  ;;  %v1211_v8 = vsub.s32 3, %v1198_v48 }
 0x1d9   : > { %1125 = vmatprep.subr.bf16.mxu0 %v1759_v9  ;;  %1166 = vmatprep.subr.bf16.mxu1 %v1779_v15  ;;  %v716_v9 = vld [vmem:[#allocation3 + $0x18] sm:$0xff]  ;;  %p1989_p3 = por %p1988_p4, %p1987_p0 }
 0x1da   : > { %v1212_v14 = vrot.slane %v1195_v50, %v1211_v8 }
 0x1db   : > { %p1990_p6 = pnand %p1989_p3, %p1983_p5 }
 0x1dc   : > { %1126 = vmatpush1.bf16.msra.mxu0 %v1763_v12  ;;  %1167 = vmatpush1.bf16.msra.mxu1 %v1782_v18 }
 0x1dd   : > { %1127 = vmatprep.subr.bf16.mxu0 %v1765_v13  ;;  %1168 = vmatprep.subr.bf16.mxu1 %v1785_v19 }
 0x1e0   : > { %1128 = vmatpush1.bf16.msra.mxu0 %v1769_v16  ;;  %1169 = vmatpush1.bf16.msra.mxu1 %v1788_v24 }
 0x1e1   : > { %1129 = vmatprep.subr.bf16.mxu0 %v1771_v17  ;;  %1170 = vmatprep.subr.bf16.mxu1 %v1791_v25 }
 0x1e4   : > { %1130 = vmatpush1.bf16.msra.mxu0 %v1775_v20  ;;  %1171 = vmatpush1.bf16.msra.mxu1 %v1794_v28 }
 0x1e5   : > { %1131 = vmatprep.subr.bf16.mxu0 %v1777_v22  ;;  %1172 = vmatprep.subr.bf16.mxu1 %v1797_v29 }
 0x1e8   : > { %1132 = vmatpush1.bf16.msra.mxu0 %v1781_v26  ;;  %1173 = vmatpush1.bf16.msra.mxu1 %v1800_v32 }
 0x1e9   : > { %1133 = vmatprep.subr.bf16.mxu0 %v1783_v27  ;;  %1174 = vmatprep.subr.bf16.mxu1 %v1803_v33 }
 0x1ec   : > { %1134 = vmatpush1.bf16.msra.mxu0 %v1787_v30  ;;  %1175 = vmatpush1.bf16.msra.mxu1 %v1806_v36 }
 0x1ed   : > { %1135 = vmatprep.subr.bf16.mxu0 %v1789_v31  ;;  %1176 = vmatprep.subr.bf16.mxu1 %v1809_v37 }
 0x1f0   : > { %1136 = vmatpush1.bf16.msra.mxu0 %v1793_v34  ;;  %1177 = vmatpush1.bf16.msra.mxu1 %v1811_v40 }
 0x1f1   : > { %1137 = vmatprep.subr.bf16.mxu0 %v1795_v35  ;;  %1178 = vmatprep.subr.bf16.mxu1 %v1812_v41 }
 0x1f4   : > { %1138 = vmatpush1.bf16.msra.mxu0 %v1799_v38  ;;  %1179 = vmatpush1.bf16.msra.mxu1 %v1814_v43 }
 0x1f5   : > { %1139 = vmatprep.subr.bf16.mxu0 %v1801_v39  ;;  %1180 = vmatprep.subr.bf16.mxu1 %v1815_v44 }
 0x1f8   : > { %1140 = vmatpush1.bf16.msra.mxu0 %v1805_v42  ;;  %1181 = vmatpush1.bf16.msra.mxu1 %v1817_v46 }
 0x1fb   : > { %1142 = vmatmul.mubr.bf16.vlgmr.msra.gmra.mrb[0].mxu0 %v1510_v45  ;;  %1183 = vmatmul.mubr.bf16.vlgmr.msra.gmra.mrb[0].mxu1 %v1510_v45 }
 0x2ce   : > { %v1143_v55 = vpop.f32.mrb[0].mxu0  ;;  %v1184_v3 = vpop.f32.mrb[0].mxu1 }
 0x2cf   : > { %v1191_v57 = vadd.f32 %v1143_v55, %v713_v52  ;;  %v1145_v58 = vpop.f32.mrb[1].mxu0  ;;  %v1193_v6 = vadd.f32 %v1184_v3, %v715_v0  ;;  %v1186_v7 = vpop.f32.mrb[1].mxu1 }
 0x2d0   : > { %v1192_v60 = vadd.f32 %v1145_v58, %v714_v54  ;;  %v1147_v61 = vpop.f32.mrb[2].mxu0  ;;  %v1188_v10 = vpop.f32.mrb[2].mxu1  ;;  %v1194_v13 = vadd.f32 %v1186_v7, %v716_v9 }
 0x2d1   : > { %v1217_v62 = vadd.f32 %v1200_v53, %v1191_v57  ;;  %v1148_v63 = vpop.f32.mrb[3].mxu0  ;;  %v1189_v11 = vpop.f32.mrb[3].mxu1  ;;  %v1219_v12 = vadd.f32 %v1208_v4, %v1193_v6 }
 0x2d2   : > { %v1218_v1 = vadd.f32 %v1204_v56, %v1192_v60  ;;  %v1220_v16 = vadd.f32 %v1212_v14, %v1194_v13 }
 0x2d3   : > { %v1576_v2 = vmul.f32 -1.442695, %v1217_v62  ;;  %v1578_v15 = vmul.f32 -1.442695, %v1219_v12 }
 0x2d4   : > { %v1577_v5 = vmul.f32 -1.442695, %v1218_v1 }
 0x2d5   : > { %1818 = vpow2.f32 %v1576_v2 }
 0x2d6   : > { %1820 = vpow2.f32 %v1577_v5 }
 0x2d7   : > { %1822 = vpow2.f32 %v1578_v15 }
 0x2d8   : > { %1824 = vtanh.f32 %v1220_v16 }
 0x2df   : > { %v1819_v17 = vpop.eup %1818 }
 0x2e0   : > { %v1821_v18 = vpop.eup %1820  ;;  %v1224_v19 = vadd.f32 1.0, %v1819_v17 }
 0x2e1   : > { %v1230_v20 = vadd.f32 1.0, %v1821_v18  ;;  %v1823_v21 = vpop.eup %1822 }
 0x2e2   : > { %1826 = vrcp.f32 %v1224_v19  ;;  %v1825_v22 = vpop.eup %1824  ;;  %v1236_v25 = vadd.f32 1.0, %v1823_v21 }
 0x2e3   : > { %1828 = vrcp.f32 %v1230_v20 }
 0x2e4   : > { %1830 = vrcp.f32 %v1236_v25 }
 0x2ec   : > { %v1827_v24 = vpop.eup %1826 }
 0x2ed   : > { %v1829_v26 = vpop.eup %1828  ;;  %v1242_v27 = vmul.f32 %v1827_v24, %v1825_v22 }
 0x2ee   : > { %v1241_v28 = vmul.f32 %v1829_v26, %v1240_v23 }
 0x2f0   : > { %v1243_v29 = vadd.f32 %v1242_v27, %v1241_v28 }
 0x2f2   : > { %1248 = vst [vmem:[%s2413_s26] sm:$0xff] %v1243_v29  ;;  %1832 = vtanh.f32 %v1243_v29 }
 0x2f3   : > { %1993 = shalt.err (!%p1990_p6)
}
 0x2f4   : > { %s1994_s29 = scalar_lea.hbm %s2490_s24, 128  ;;  %s1998_s15 = scalar_lea.hbm %s2574_s7, 256 }
 0x2f5   : > { %p1995_p12 = scmp.ne.s32.totalorder %s2490_s24, %s1994_s29  ;;  %p1999_p10 = scmp.lt.u32.totalorder %s2490_s24, %s2574_s7 }
 0x2f6   : > { %p2000_p9 = scmp.lt.u32.totalorder %s1998_s15, %s1994_s29  ;;  %p2002_p2 = scmp.lt.u32.totalorder %s1994_s29, %s2490_s24 }
 0x2f7   : > { %p1996_p7 = pnand %p1995_p12, %p2630_p11 }
 0x2f8   : > { %p2001_p1 = por %p2000_p9, %p1999_p10 }
 0x2f9   : > { %p1997_p8 = pneg %p1996_p7 }
 0x2fa   : > { %p2003_p13 = por %p2002_p2, %p2001_p1 }
 0x2fc   : > { %p2004_p5 = pnand %p2003_p13, %p1997_p8 }
 0x2fe   : > { %2007 = shalt.err (!%p2004_p5)
}
 0x2ff   : > { %1601 = dma.vmem_to_hbm [thread:$0]  (%p2630_p11), %s2492_s23, 128, %s2490_s24, %s1256_s22   ;;  %v1831_v30 = vpop.eup %1830 }
 0x300   : > { %v1833_v31 = vpop.eup %1832  ;;  %s1581_s2 = sshll.u32 %s2160_s28, 6  ;;  %s1269_s11 = sshll.u32 %s2411_s13, 4  ;;  %s2524_s11 = int_to_ptr.vmem [resolvable:$true] %s1269_s11 }
 0x301   : > { %v1245_v32 = vmul.f32 %v1833_v31, %v1831_v30  ;;  %s2522_s8 = scalar_lea.hbm %s2573_s6, %s1581_s2  ;;  %s1251_s19 = scalar_lea.sflag [#allocation6], %s2391_s17 }
 0x302   : > { %s2008_s23 = scalar_lea.vmem %s2524_s11, 64  ;;  %s2098_s28 = smov [#allocation12]  }
 0x303   : > { %v1246_v33 = vpack.c.bf16 %v1245_v32, %v1245_v32  ;;  %p2009_p0 = scmp.ne.s32.totalorder %s2524_s11, %s2008_s23  ;;  %s2012_s24 = sshll.u32 %s2098_s28, 4  ;;  %s2013_s24 = int_to_ptr.vmem [resolvable:$false] %s2012_s24 }
 0x304   : > { %s2014_s22 = scalar_lea.vmem %s2013_s24, 128  ;;  %p2015_p6 = scmp.lt.s32.totalorder %s2524_s11, %s2013_s24 }
 0x305   : > { %1247 = vst [vmem:[%s2411_s13] sm:$0xf] %v1246_v33  ;;  %1249 = vst [vmem:[#allocation2] sm:$0xf] %v1246_v33  ;;  %p2010_p4 = pnand %p2009_p0, %p2630_p11  ;;  %p2016_p12 = scmp.lt.s32.totalorder %s2014_s22, %s2008_s23 }
 0x307   : > { %p2011_p3 = pneg %p2010_p4  ;;  %p2017_p7 = por %p2016_p12, %p2015_p6 }
 0x309   : > { %p2018_p8 = pnand %p2017_p7, %p2011_p3 }
 0x30b   : > { %2021 = shalt.err (!%p2018_p8)
}
 0x30c   : > { %s2022_s17 = scalar_lea.hbm %s2522_s8, 64  ;;  %s2026_s21 = scalar_lea.hbm %s2573_s6, 128 }
 0x30d   : > { %p2023_p10 = scmp.ne.s32.totalorder %s2522_s8, %s2022_s17  ;;  %p2027_p2 = scmp.lt.u32.totalorder %s2522_s8, %s2573_s6 }
 0x30e   : > { %p2028_p13 = scmp.lt.u32.totalorder %s2026_s21, %s2022_s17  ;;  %p2030_p0 = scmp.lt.u32.totalorder %s2022_s17, %s2522_s8 }
 0x30f   : > { %p2024_p9 = pnand %p2023_p10, %p2630_p11 }
 0x310   : > { %p2029_p5 = por %p2028_p13, %p2027_p2 }
 0x311   : > { %p2025_p1 = pneg %p2024_p9 }
 0x312   : > { %p2031_p4 = por %p2030_p0, %p2029_p5 }
 0x314   : > { %p2032_p3 = pnand %p2031_p4, %p2025_p1 }
 0x316   : > { %2035 = shalt.err (!%p2032_p3)
}
 0x317   : > { %1600 = dma.vmem_to_hbm [thread:$0]  (%p2630_p11), %s2524_s11, 64, %s2522_s8, %s1251_s19  }
 0x318 PF: > { %s2631_s29 = sld [smem:[#allocation20_spill]]  ;;  %s2632_s9 = sld [smem:[#allocation24_spill]] }
 0x319   : > { %p2634_p12 = scmp.ge.s32.totalorder %s2086_s27, 2 }
 0x31e   : > { %s1294_s10 = sand.u32 1, %s2631_s29   ;;  %p2633_p6 = scmp.ne.s32.totalorder %s2632_s9, 0 }
 0x31f   : > { %s1295_s15 = scalar_lea.sflag [#allocation6], %s1294_s10 }
 0x320   : > { %p1622_p7 = pnand %p2634_p12, %p2633_p6 }
 0x322   : > { %2065 = dma.done.wait (!%p1622_p7), %s1295_s15, 64  }
 0x323   : > { %2067 = vsyncadd (!%p1622_p7), %s1295_s15, 4294967232  ;;  %s1304_s18 = scalar_lea.sflag [#allocation14], %s1294_s10 }
 0x324   : > { %2069 = dma.done.wait (!%p1622_p7), %s1304_s18, 128  }
 0x325   : > { %2071 = vsyncadd (!%p1622_p7), %s1304_s18, 4294967168  ;;  %s2635_s27 = sld [smem:[#allocation22_spill]]  ;;  %s2636_s12 = sld [smem:[#allocation21_spill]] }
 0x326   : > { %s2637_s26 = sld [smem:[#allocation23_spill]]  ;;  %s2638_s24 = smov %s2078_s25 }
 0x32b   : > { %p23_p11 = scmp.ge.s32.totalorder %s2635_s27, 4   ;;  %s2639_s25 = smov %s2636_s12 }
 0x32d   :  { %25 = sbr.rel (!%p23_p11) target bundleno = 10 (0xa), region = 146 }
 0x334   :  { %1309 = vsyncpa [#allocation5], 1 }
 0x335   :  { %1311 = vsyncpa [#allocation5 + $0x1], 1 }
 0x336   :  { %1312 = vsyncpa [#allocation8], 1 }
 0x337   :  { %1313 = vsyncpa [#allocation6], 1 }
 0x338   :  { %1315 = vsyncpa [#allocation6 + $0x1], 1 }
 0x339   :  { %1316 = vsyncpa [#allocation14], 1 }
 0x33a   :  { %1318 = vsyncpa [#allocation14 + $0x1], 1 }

</bundles_post_ra>
